<compile_context>
chip_gen: v7x
topology: tpu7x:2x2x1
jax: 0.10.0
libtpu: 0.0.40
codegen_flags: <defaults>
</compile_context>

<pallas_src>
import functools

import jax
import jax.numpy as jnp
from jax import lax
from jax.experimental import pallas as pl
from jax.experimental.pallas import tpu as pltpu


# --------------------------------------------------------------------------
# small helpers
# --------------------------------------------------------------------------
def _round_up(v, m):
    return ((v + m - 1) // m) * m


def _fit_tile(size, cap, align):
    """Largest tile <= cap (multiple of align) that minimizes padding waste."""
    blocks = -(-size // cap)                       # ceil(size / cap)
    return min(_round_up(-(-size // blocks), align), cap)


def _vmem_capacity_bytes():
    try:
        return int(pltpu.get_tpu_info().vmem_capacity_bytes)
    except Exception:
        return 64 << 20        # conservative (v7x-sized) fallback


def _choose_tiles(N, M, D, x_it, idx_it, out_it):
    """Shape- and generation-adaptive tile selection.

    Returns (tm, tn, tk, vmem_limit_bytes).
    """
    vmem_cap = _vmem_capacity_bytes()
    small_vmem = vmem_cap < (100 << 20)            # v7x: 64 MiB / TensorCore
    # Total pipelined working set (double-buffered in/out tiles + f32 acc),
    # with headroom for internal scratch: ~36 MiB on v7x, ~72 MiB on v5e/v6e.
    budget = (36 << 20) if small_vmem else (72 << 20)

    sub_align = 16 if min(x_it, idx_it, out_it) < 4 else 8
    tm = _fit_tile(N, 512, sub_align)
    tn = _fit_tile(M, 2048, 128)
    tk = D

    # v7x megacore: keep >= 2 blocks along the *index* (M) axis when possible
    # so the two TensorCores split the big operand instead of each streaming
    # the full index. On 1-TC chips (v5e/v6e) we never force-split.
    if small_vmem:
        m_min = _round_up(M, 128)
        if m_min >= 256:
            tn = min(tn, _round_up(-(-m_min // 2), 128))

    def vmem_use(tm_, tn_, tk_):
        io = (tm_ * tk_ * x_it + tn_ * tk_ * idx_it     # operand tiles
              + tm_ * 4 + tn_ * 4                       # row-norm vectors
              + tm_ * tn_ * out_it)                     # output tile
        return 2 * io + tm_ * tn_ * 4                   # double-buffer + acc

    # Shrink order: K (feature dim) first -- keeps tm/tn big and the output
    # lane-dense -- then tm (sublane occupancy only), then tn last.
    while vmem_use(tm, tn, tk) > budget:
        if tk > 128:
            tk = max(128, _round_up(tk // 2, 128))
        elif tm > sub_align:
            tm = max(sub_align, _round_up(tm // 2, sub_align))
        elif tn > 128:
            tn = max(128, _round_up(tn // 2, 128))
        else:
            break

    vmem_limit = int(min((40 << 20) if small_vmem else (100 << 20),
                         max(32 << 20, vmem_use(tm, tn, tk) + (8 << 20))))
    return tm, tn, tk, vmem_limit


# --------------------------------------------------------------------------
# kernels
# --------------------------------------------------------------------------
def _dot_nt(a_ref, b_ref):
    # (tm, tk) x (tn, tk) -> (tm, tn): contract the last dim of BOTH operands,
    # so the MXU consumes the (tn, tk) index tile with no in-VMEM transpose.
    return lax.dot_general(a_ref[...], b_ref[...],
                           dimension_numbers=(((1,), (1,)), ((), ())),
                           preferred_element_type=jnp.float32)


def _l2_write(dot, xsq_ref, isq_ref, o_ref, squared):
    sq = jnp.maximum((xsq_ref[...] - 2.0 * dot) + isq_ref[...], 0.0)
    o_ref[...] = (sq if squared else jnp.sqrt(sq)).astype(o_ref.dtype)


def _l2_kernel_direct(x_ref, idx_ref, xsq_ref, isq_ref, o_ref, *, squared):
    _l2_write(_dot_nt(x_ref, idx_ref), xsq_ref, isq_ref, o_ref, squared)


def _l2_kernel_acc(x_ref, idx_ref, xsq_ref, isq_ref, o_ref, acc_ref, *, squared):
    @pl.when(pl.program_id(2) == 0)
    def _():
        acc_ref[...] = jnp.zeros_like(acc_ref)

    acc_ref[...] += _dot_nt(x_ref, idx_ref)

    @pl.when(pl.program_id(2) == pl.num_programs(2) - 1)
    def _():
        _l2_write(acc_ref[...], xsq_ref, isq_ref, o_ref, squared)


def _ip_kernel_direct(x_ref, idx_ref, o_ref):
    o_ref[...] = _dot_nt(x_ref, idx_ref).astype(o_ref.dtype)


def _ip_kernel_acc(x_ref, idx_ref, o_ref, acc_ref):
    @pl.when(pl.program_id(2) == 0)
    def _():
        acc_ref[...] = jnp.zeros_like(acc_ref)

    acc_ref[...] += _dot_nt(x_ref, idx_ref)

    @pl.when(pl.program_id(2) == pl.num_programs(2) - 1)
    def _():
        o_ref[...] = acc_ref[...].astype(o_ref.dtype)


# --------------------------------------------------------------------------
# pallas_call wrapper on pre-padded operands
# --------------------------------------------------------------------------
@functools.partial(
    jax.jit,
    static_argnames=("metrics", "out_dtype", "squared",
                     "n", "m", "tm", "tn", "tk", "vmem_limit"))
def _match_padded(x, index, index_sq, *, metrics, out_dtype, squared,
                  n, m, tm, tn, tk, vmem_limit):
    """x: (N_pad, D_pad), index: (M_pad, D_pad), index_sq: (1, M_pad) f32|None."""
    N_pad, D_pad = x.shape
    M_pad, _ = index.shape
    grid_n, grid_m, grid_k = N_pad // tm, M_pad // tn, D_pad // tk
    x_it = jnp.dtype(x.dtype).itemsize
    idx_it = jnp.dtype(index.dtype).itemsize
    out_it = jnp.dtype(out_dtype).itemsize

    # ---- adaptive grid order: the operand that would be re-fetched more goes
    # on the slow (outer) axis; the K axis stays innermost (reduction).
    x_bytes, i_bytes = N_pad * D_pad * x_it, M_pad * D_pad * idx_it
    traffic_m_outer = (i_bytes if grid_k == 1 else grid_n * i_bytes) + grid_m * x_bytes
    traffic_n_outer = (x_bytes if grid_k == 1 else grid_m * x_bytes) + grid_n * i_bytes
    m_outer = traffic_m_outer <= traffic_n_outer

    if m_outer:                       # index on the slow axis, queries fast
        grid = (grid_m, grid_n, grid_k)
        x_map = lambda a, b, k: (b, k)
        idx_map = lambda a, b, k: (a, k)
        out_map = lambda a, b, k: (b, a)
        xsq_map = lambda a, b, k: (b, 0)
        isq_map = lambda a, b, k: (0, a)
        traffic = traffic_m_outer
    else:                             # queries on the slow axis, index fast
        grid = (grid_n, grid_m, grid_k)
        x_map = lambda a, b, k: (a, k)
        idx_map = lambda a, b, k: (b, k)
        out_map = lambda a, b, k: (a, b)
        xsq_map = lambda a, b, k: (a, 0)
        isq_map = lambda a, b, k: (0, b)
        traffic = traffic_n_outer

    x_spec = pl.BlockSpec((tm, tk), x_map)
    idx_spec = pl.BlockSpec((tn, tk), idx_map)
    out_spec = pl.BlockSpec((tm, tn), out_map)
    out_shape = jax.ShapeDtypeStruct((N_pad, M_pad), out_dtype)

    compiler_params = pltpu.CompilerParams(
        dimension_semantics=("parallel", "parallel", "arbitrary"),
        vmem_limit_bytes=vmem_limit)

    is_l2 = metrics == "L2"
    cost = pl.CostEstimate(
        flops=2 * N_pad * M_pad * D_pad,
        transcendentals=(N_pad * M_pad) if (is_l2 and not squared) else 0,
        bytes_accessed=int(traffic + N_pad * M_pad * out_it
                           + ((N_pad + M_pad) * 4 if is_l2 else 0)))

    multi_k = grid_k > 1
    scratch = [pltpu.VMEM((tm, tn), jnp.float32)] if multi_k else []

    if is_l2:
        # Query norms are the only per-call norm work; index norms arrive
        # precomputed and lane-dense as (1, M_pad).
        x_sq = jnp.sum(x.astype(jnp.float32) ** 2, axis=-1, keepdims=True)
        kernel = functools.partial(
            _l2_kernel_acc if multi_k else _l2_kernel_direct, squared=squared)
        in_specs = [x_spec, idx_spec,
                    pl.BlockSpec((tm, 1), xsq_map),
                    pl.BlockSpec((1, tn), isq_map)]
        args = (x, index, x_sq, index_sq)
    elif metrics == "IP":
        kernel = _ip_kernel_acc if multi_k else _ip_kernel_direct
        in_specs = [x_spec, idx_spec]
        args = (x, index)
    else:
        raise ValueError(f"unsupported metric: {metrics}")

    out = pl.pallas_call(
        kernel,
        out_shape=out_shape,
        grid_spec=pltpu.PrefetchScalarGridSpec(
            num_scalar_prefetch=0,
            grid=grid,
            in_specs=in_specs,
            out_specs=out_spec,
            scratch_shapes=scratch),
        compiler_params=compiler_params,
        cost_estimate=cost,
    )(*args)

    if (N_pad, M_pad) != (n, m):
        out = out[:n, :m]
    return out


# --------------------------------------------------------------------------
# public API
# --------------------------------------------------------------------------
def match_features(x, index, metrics="L2", *, out_dtype=jnp.float32,
                   squared=False, _tiles=None):
    """Functional Pallas implementation of IndexForOnnx.forward.

    x: (N, D) queries, index: (M, D) stored features -> (N, M) matrix.
    out_dtype=jnp.bfloat16 is recommended for large N*M (halves the dominant
    HBM writeback); squared=True skips the per-element sqrt (for argmin/top-k).
    """
    N, D = x.shape
    M, D2 = index.shape
    if D != D2:
        raise ValueError("feature dims must match")

    x_it = jnp.dtype(x.dtype).itemsize
    idx_it = jnp.dtype(index.dtype).itemsize
    out_it = jnp.dtype(out_dtype).itemsize
    if _tiles is None:
        tm, tn, tk, vmem_limit = _choose_tiles(N, M, D, x_it, idx_it, out_it)
    else:
        tm, tn, tk = _tiles
        vmem_limit = 32 << 20

    N_pad, M_pad, D_pad = _round_up(N, tm), _round_up(M, tn), _round_up(D, tk)
    if (N_pad, D_pad) != (N, D):
        x = jnp.pad(x, ((0, N_pad - N), (0, D_pad - D)))
    if (M_pad, D_pad) != (M, D):
        index = jnp.pad(index, ((0, M_pad - M), (0, D_pad - D)))

    index_sq = None
    if metrics == "L2":
        index_sq = jnp.sum(index.astype(jnp.float32) ** 2, axis=-1)[None, :]

    return _match_padded(x, index, index_sq, metrics=metrics,
                         out_dtype=out_dtype, squared=squared,
                         n=N, m=M, tm=tm, tn=tn, tk=tk,
                         vmem_limit=vmem_limit)


class IndexForOnnxPallas:
    """Mirror of the PyTorch module: holds the `index` parameter.

    The index is a fixed parameter, so its padding and ||index||^2 are
    computed once (hoisted out of the per-call path, per perf review).
    """

    def __init__(self, index):
        self.index = index
        self._M, self._D = index.shape
        self._index_sq = jnp.sum(index.astype(jnp.float32) ** 2,
                                 axis=-1)[None, :]           # (1, M) f32
        self._prep_cache = {}                                # (tn, tk) -> (idx, isq)

    def _prepared(self, tn, tk):
        key = (tn, tk)
        if key not in self._prep_cache:
            M_pad, D_pad = _round_up(self._M, tn), _round_up(self._D, tk)
            idx = self.index
            if (M_pad, D_pad) != (self._M, self._D):
                idx = jnp.pad(idx, ((0, M_pad - self._M), (0, D_pad - self._D)))
            isq = self._index_sq
            if M_pad != self._M:
                isq = jnp.pad(isq, ((0, 0), (0, M_pad - self._M)))
            self._prep_cache[key] = (idx, isq)
        return self._prep_cache[key]

    def __call__(self, x, metrics="L2", *, out_dtype=jnp.float32, squared=False):
        N, D = x.shape
        if D != self._D:
            raise ValueError("feature dims must match")
        tm, tn, tk, vmem_limit = _choose_tiles(
            N, self._M, D, jnp.dtype(x.dtype).itemsize,
            jnp.dtype(self.index.dtype).itemsize, jnp.dtype(out_dtype).itemsize)
        idx_p, isq_p = self._prepared(tn, tk)
        N_pad, D_pad = _round_up(N, tm), idx_p.shape[1]
        if (N_pad, D_pad) != (N, D):
            x = jnp.pad(x, ((0, N_pad - N), (0, D_pad - D)))
        return _match_padded(x, idx_p, isq_p if metrics == "L2" else None,
                             metrics=metrics, out_dtype=out_dtype,
                             squared=squared, n=N, m=self._M,
                             tm=tm, tn=tn, tk=tk, vmem_limit=vmem_limit)


# --------------------------------------------------------------------------
# demo / self-test
# --------------------------------------------------------------------------
if __name__ == "__main__":
    key = jax.random.PRNGKey(0)
    k_idx, k_x, k_idx2, k_x2 = jax.random.split(key, 4)

    # Case 1: small aligned shapes through the module class (hoisted index prep).
    N, M, D = 16, 128, 32
    index = jax.random.normal(k_idx, (M, D), dtype=jnp.float32)
    x = jax.random.normal(k_x, (N, D), dtype=jnp.float32)

    module = IndexForOnnxPallas(index)
    out_l2 = jax.block_until_ready(module(x, metrics="L2"))
    out_ip = jax.block_until_ready(module(x, metrics="IP"))

    ref_l2 = jnp.sqrt(jnp.maximum(
        jnp.sum(x * x, -1, keepdims=True) - 2.0 * (x @ index.T)
        + jnp.sum(index * index, -1)[None, :], 0.0))
    ref_ip = x @ index.T

    assert out_l2.shape == (N, M) and out_ip.shape == (N, M)
    assert jnp.max(jnp.abs(out_l2 - ref_l2)) < 1e-3
    assert jnp.max(jnp.abs(out_ip - ref_ip)) < 1e-3

    # Case 2: unaligned shapes (padding + slicing) through the free function,
    # with a forced K split to exercise the accumulator (grid_k > 1) path.
    N2, M2, D2 = 10, 200, 256
    index2 = jax.random.normal(k_idx2, (M2, D2), dtype=jnp.float32)
    x2 = jax.random.normal(k_x2, (N2, D2), dtype=jnp.float32)

    out2 = jax.block_until_ready(
        match_features(x2, index2, metrics="L2", _tiles=(16, 128, 128)))
    ref2 = jnp.sqrt(jnp.maximum(
        jnp.sum((x2[:, None, :] - index2[None, :, :]) ** 2, axis=-1), 0.0))

    assert out2.shape == (N2, M2)
    assert jnp.max(jnp.abs(out2 - ref2)) < 5e-2

    print("KERNEL_OK")
</pallas_src>

<mosaic_0001>
module attributes {stable_mosaic.version = 11 : i64} {
  func.func @_l2_kernel_direct(%arg0: i32, %arg1: i32, %arg2: i32, %arg3: memref<16x32xf32, #tpu.memory_space<vmem>>, %arg4: memref<128x32xf32, #tpu.memory_space<vmem>>, %arg5: memref<16x1xf32, #tpu.memory_space<vmem>>, %arg6: memref<1x128xf32, #tpu.memory_space<vmem>>, %arg7: memref<16x128xf32, #tpu.memory_space<vmem>>) attributes {dimension_semantics = [#tpu.dimension_semantics<parallel>, #tpu.dimension_semantics<parallel>, #tpu.dimension_semantics<arbitrary>], iteration_bounds = array<i64: 1, 1, 1>, scalar_prefetch = 0 : i64, scratch_operands = 0 : i64, tpu.core_type = #tpu.core_type<tc>, window_params = [{transform_indices = @transform_0, window_bounds = array<i64: 16, 32>}, {transform_indices = @transform_1, window_bounds = array<i64: 128, 32>}, {transform_indices = @transform_2, window_bounds = array<i64: 16, 1>}, {transform_indices = @transform_3, window_bounds = array<i64: 1, 128>}, {transform_indices = @transform_4, window_bounds = array<i64: 16, 128>}]} {
    %c0 = arith.constant 0 : index
    %c0_0 = arith.constant 0 : index
    %0 = vector.load %arg3[%c0, %c0_0] : memref<16x32xf32, #tpu.memory_space<vmem>>, vector<16x32xf32>
    %c0_1 = arith.constant 0 : index
    %c0_2 = arith.constant 0 : index
    %1 = vector.load %arg4[%c0_1, %c0_2] : memref<128x32xf32, #tpu.memory_space<vmem>>, vector<128x32xf32>
    %cst = arith.constant dense<0.000000e+00> : vector<16x128xf32>
    %2 = tpu.matmul %0, %1, %cst {dimension_numbers = #tpu.dot_dimension_numbers<[1], [1], [0], [0], [0, 0, 1, 0], [], []>} : vector<16x32xf32>, vector<128x32xf32>, vector<16x128xf32> -> vector<16x128xf32>
    %c0_3 = arith.constant 0 : index
    %c0_4 = arith.constant 0 : index
    %3 = vector.load %arg5[%c0_3, %c0_4] : memref<16x1xf32, #tpu.memory_space<vmem>>, vector<16x1xf32>
    %cst_5 = arith.constant 2.000000e+00 : f32
    %4 = vector.broadcast %cst_5 : f32 to vector<16x128xf32>
    %5 = arith.mulf %4, %2 : vector<16x128xf32>
    %6 = vector.broadcast %3 : vector<16x1xf32> to vector<16x128xf32>
    %7 = arith.subf %6, %5 : vector<16x128xf32>
    %c0_6 = arith.constant 0 : index
    %c0_7 = arith.constant 0 : index
    %8 = vector.load %arg6[%c0_6, %c0_7] : memref<1x128xf32, #tpu.memory_space<vmem>>, vector<1x128xf32>
    %9 = vector.broadcast %8 : vector<1x128xf32> to vector<16x128xf32>
    %10 = arith.addf %7, %9 : vector<16x128xf32>
    %cst_8 = arith.constant 0.000000e+00 : f32
    %11 = vector.broadcast %cst_8 : f32 to vector<16x128xf32>
    %12 = arith.maximumf %10, %11 : vector<16x128xf32>
    %13 = math.sqrt %12 : vector<16x128xf32>
    %c0_9 = arith.constant 0 : index
    %c0_10 = arith.constant 0 : index
    %14 = vector.load %arg7[%c0_9, %c0_10] : memref<16x128xf32, #tpu.memory_space<vmem>>, vector<16x128xf32>
    tpu.vector_store %arg7[%c0_9, %c0_10], %13 {strides = array<i32>} : memref<16x128xf32, #tpu.memory_space<vmem>>, vector<16x128xf32>,
    return
  }
  func.func @transform_0(%arg0: i32, %arg1: i32, %arg2: i32) -> (i32, i32) {
    %c0_i32 = arith.constant 0 : i32
    return %arg1, %arg2 : i32, i32
  }
  func.func @transform_1(%arg0: i32, %arg1: i32, %arg2: i32) -> (i32, i32) {
    %c0_i32 = arith.constant 0 : i32
    return %arg0, %arg2 : i32, i32
  }
  func.func @transform_2(%arg0: i32, %arg1: i32, %arg2: i32) -> (i32, i32) {
    %c0_i32 = arith.constant 0 : i32
    %c0_i32_0 = arith.constant 0 : i32
    return %arg1, %c0_i32 : i32, i32
  }
  func.func @transform_3(%arg0: i32, %arg1: i32, %arg2: i32) -> (i32, i32) {
    %c0_i32 = arith.constant 0 : i32
    %c0_i32_0 = arith.constant 0 : i32
    return %c0_i32, %arg0 : i32, i32
  }
  func.func @transform_4(%arg0: i32, %arg1: i32, %arg2: i32) -> (i32, i32) {
    %c0_i32 = arith.constant 0 : i32
    return %arg1, %arg0 : i32, i32
  }
}

</mosaic_0001>

<bundles_post_ra>
// kernel: _match_padded.1
= control target key start
LH: loop header
LB: loop body
LE: loop exit
PB: predicated region body
PF: predicated region fallthrough
CT: control target
= control target key end

     0   :  { %vm36_vm0 = vcmask 261120   ;;  %v378_v6 = vmov 0   ;;  %s522_s0 = inlined_call_operand.vmem [shape: f32[16,32], index: 0, kind: input, shape index: {}]   ;;  %s523_s1 = inlined_call_operand.vmem [shape: f32[128,32], index: 1, kind: input, shape index: {}]   ;;  %s524_s2 = inlined_call_operand.vmem [shape: f32[16,1], index: 2, kind: input, shape index: {}]   ;;  %s525_s3 = inlined_call_operand.vmem [shape: f32[1,128], index: 3, kind: input, shape index: {}]   ;;  %s526_s4 = inlined_call_operand.hbm [shape: f32[16,128], index: 4, kind: output, shape index: {}]  }
   0x1   :  { %v20_v0 = vld [vmem:[%s523_s1] sm:$0xff]  ;;  %v21_v1 = vld [vmem:[%s523_s1 + $0x8] sm:$0xff]  ;;  %v22_v2 = vld [vmem:[%s523_s1 + $0x10] sm:$0xff]  ;;  %349 = vset.pattern.permute.xlu0 %v378_v6 }
   0x2   :  { %v297_v3 = vpack.c.bf16 %v21_v1, %v20_v0  ;;  %vm418_vm1 = vmpackc.low %vm36_vm0, %vm36_vm0  ;;  %v23_v5 = vld [vmem:[%s523_s1 + $0x18] sm:$0xff]  ;;  %v18_v8 = vld [vmem:[%s522_s0] sm:$0xff] }
   0x3   :  { %v303_v7 = vpack.c.bf16 %v23_v5, %v22_v2  ;;  %v24_v9 = vld [vmem:[%s523_s1 + $0x20] sm:$0xff]  ;;  %v25_v10 = vld [vmem:[%s523_s1 + $0x28] sm:$0xff]  ;;  %294 = vmatprep.mubr.msk.f32.mxu0 %vm36_vm0, %v18_v8 }
   0x4   :  { %299 = vmatprep.subr.msk.bf16.mxu0 %vm418_vm1, %v297_v3  ;;  %v166_v11 = vld [vmem:[%s524_s2] sm:$0xff] }
   0x5   :  { %302 = vmatpush3.bf16.xpose.msk.msra.mxu0 %vm418_vm1, %v297_v3  ;;  %172 = vperm.xlu0 %349, %v166_v11  }
   0x6   :  { %305 = vmatprep.subr.msk.bf16.mxu0 %vm418_vm1, %v303_v7 }
   0x7   :  { %9 = vsyncpa [#allocation3], 0  ;;  %v167_v12 = vld [vmem:[%s524_s2 + $0x8] sm:$0xff]  ;;  %v309_v13 = vpack.c.bf16 %v25_v10, %v24_v9  ;;  %v26_v14 = vld [vmem:[%s523_s1 + $0x30] sm:$0xff] }
   0x8   :  { %v27_v15 = vld [vmem:[%s523_s1 + $0x38] sm:$0xff]  ;;  %v28_v17 = vld [vmem:[%s523_s1 + $0x40] sm:$0xff]  ;;  %v29_v18 = vld [vmem:[%s523_s1 + $0x48] sm:$0xff] }
   0x9   :  { %177 = vperm.xlu0 %349, %v167_v12   ;;  %v315_v16 = vpack.c.bf16 %v27_v15, %v26_v14  ;;  %v321_v19 = vpack.c.bf16 %v29_v18, %v28_v17  ;;  %v30_v20 = vld [vmem:[%s523_s1 + $0x50] sm:$0xff]  ;;  %v31_v21 = vld [vmem:[%s523_s1 + $0x58] sm:$0xff]  ;;  %v32_v23 = vld [vmem:[%s523_s1 + $0x60] sm:$0xff] }
   0xa   :  { %v327_v22 = vpack.c.bf16 %v31_v21, %v30_v20  ;;  %v33_v24 = vld [vmem:[%s523_s1 + $0x68] sm:$0xff]  ;;  %v34_v26 = vld [vmem:[%s523_s1 + $0x70] sm:$0xff]  ;;  %v35_v27 = vld [vmem:[%s523_s1 + $0x78] sm:$0xff] }
   0xb   :  { %v333_v25 = vpack.c.bf16 %v33_v24, %v32_v23  ;;  %v339_v28 = vpack.c.bf16 %v35_v27, %v34_v26  ;;  %v19_v29 = vld [vmem:[%s522_s0 + $0x8] sm:$0xff]  ;;  %v243_v35 = vld [vmem:[%s525_s3] ss:$0 sm:$0xff]  ;;  %s379_s0 = smov [#allocation2]  }
   0xc   :  { %s214_s29 = sshll.u32 %s379_s0, 4  ;;  %s215_s29 = int_to_ptr.vmem [resolvable:$true] %s214_s29 }
   0xd   :  { %308 = vmatpush3.bf16.xpose.msk.msra.mxu0 %vm418_vm1, %v303_v7  ;;  %s354_s3 = scalar_lea.vmem %s215_s29, 256  ;;  %p359_p1 = scmp.lt.s32.totalorder %s215_s29, %s215_s29 }
   0xe   :  { %311 = vmatprep.subr.msk.bf16.mxu0 %vm418_vm1, %v309_v13  ;;  %p355_p0 = scmp.ne.s32.totalorder %s215_s29, %s354_s3  ;;  %p360_p2 = scmp.lt.s32.totalorder %s354_s3, %s354_s3 }
  0x10   :  { %p361_p3 = por %p360_p2, %p359_p1 }
  0x12   :  { %p362_p4 = pnand %p361_p3, %p355_p0 }
  0x15   :  { %314 = vmatpush3.bf16.xpose.msk.msra.mxu0 %vm418_vm1, %v309_v13 }
  0x16   :  { %317 = vmatprep.subr.msk.bf16.mxu0 %vm418_vm1, %v315_v16 }
  0x1d   :  { %320 = vmatpush3.bf16.xpose.msk.msra.mxu0 %vm418_vm1, %v315_v16 }
  0x1e   :  { %323 = vmatprep.subr.msk.bf16.mxu0 %vm418_vm1, %v321_v19 }
  0x25   :  { %326 = vmatpush3.bf16.xpose.msk.msra.mxu0 %vm418_vm1, %v321_v19 }
  0x26   :  { %329 = vmatprep.subr.msk.bf16.mxu0 %vm418_vm1, %v327_v22 }
  0x2d   :  { %332 = vmatpush3.bf16.xpose.msk.msra.mxu0 %vm418_vm1, %v327_v22 }
  0x2e   :  { %335 = vmatprep.subr.msk.bf16.mxu0 %vm418_vm1, %v333_v25 }
  0x35   :  { %338 = vmatpush3.bf16.xpose.msk.msra.mxu0 %vm418_vm1, %v333_v25 }
  0x36   :  { %341 = vmatprep.subr.msk.bf16.mxu0 %vm418_vm1, %v339_v28 }
  0x3d   :  { %344 = vmatpush3.bf16.xpose.msk.msra.mxu0 %vm418_vm1, %v339_v28 }
  0x44   :  { %295 = vmatmul.mubr.msk.f32.vlgmr.msra.gmra.mrb[0].mxu0 %vm36_vm0, %v19_v29 }
  0x84   :  { %v173_v30 = vpop.permute.xlu0 %172 }
  0x88   :  { %v178_v34 = vpop.permute.xlu0 %177 }
 0x117   :  { %v296_v31 = vpop.f32.mrb[0].mxu0 }
 0x118   :  { %v169_v32 = vmul.f32 2.0, %v296_v31  ;;  %v157_v33 = vpop.f32.mrb[1].mxu0 }
 0x119   :  { %v168_v36 = vmul.f32 2.0, %v157_v33 }
 0x11a   :  { %v181_v37 = vsub.f32 %v178_v34, %v169_v32 }
 0x11b   :  { %v180_v38 = vsub.f32 %v173_v30, %v168_v36 }
 0x11c   :  { %v190_v39 = vadd.f32 %v243_v35, %v181_v37 }
 0x11d   :  { %v189_v40 = vadd.f32 %v243_v35, %v180_v38 }
 0x11e   :  { %v192_v41 = vmax.f32 %v190_v39, 0.0 }
 0x11f   :  { %v191_v42 = vmax.f32 %v189_v40, 0.0 }
 0x120   :  { %350 = vrsqrt.f32 %v192_v41  ;;  %vm202_vm2 = vcmp.eq.f32.partialorder %v192_v41, inf  ;;  %v205_v47 = vand.u32 2147483648, %v192_v41  ;;  %vm204_vm4 = vcmp.eq.f32.partialorder %v192_v41, 0.0 }
 0x121   :  { %352 = vrsqrt.f32 %v191_v42  ;;  %vm195_vm3 = vcmp.eq.f32.partialorder %v191_v42, inf  ;;  %v198_v48 = vand.u32 2147483648, %v191_v42  ;;  %vm197_vm5 = vcmp.eq.f32.partialorder %v191_v42, 0.0 }
 0x12a   :  { %v351_v43 = vpop.eup %350 }
 0x12b   :  { %v353_v44 = vpop.eup %352  ;;  %v201_v45 = vmul.f32 %v351_v43, %v192_v41 }
 0x12c   :  { %v194_v46 = vmul.f32 %v353_v44, %v191_v42 }
 0x12d   :  { %v203_v49 = vsel %vm202_vm2, %v192_v41, %v201_v45 }
 0x12e   :  { %v196_v50 = vsel %vm195_vm3, %v191_v42, %v194_v46  ;;  %v206_v51 = vsel %vm204_vm4, %v205_v47, %v203_v49 }
 0x12f   :  { %v199_v52 = vsel %vm197_vm5, %v198_v48, %v196_v50  ;;  %208 = vst [vmem:[#allocation2 + $0x8] sm:$0xff] %v206_v51 }
 0x130   :  { %207 = vst [vmem:[#allocation2] sm:$0xff] %v199_v52 }
 0x131   :  { %365 = shalt.err (!%p362_p4)
}
 0x132   :  { %s366_s6 = scalar_lea.hbm %s526_s4, 256 }
 0x133   :  { %p367_p5 = scmp.ne.s32.totalorder %s526_s4, %s366_s6  ;;  %p370_p6 = scmp.lt.u32.totalorder %s366_s6, %s526_s4 }
 0x135   :  { %p372_p7 = pnand %p370_p6, %p367_p5 }
 0x137   :  { %375 = shalt.err (!%p372_p7)
}
 0x138   :  { %s380_s2 = smov 128   ;;  %s381_s11 = smov 8  }
 0x139   :  { %220 = dma.vmem_to_hbm [thread:$0]  %s215_s29, 256, %s526_s4, [#allocation3], %s380_s2, %s380_s2, %s381_s11  }
 0x13a   :  { %376 = dma.done.wait [#allocation3], 256  }
 0x13b   :  { %377 = vsyncadd [#allocation3], 4294967040 }
 0x13c   :  { %224 = vsyncpa [#allocation3], 1 }

</bundles_post_ra>
